<compile_context>
chip_gen: v7x
topology: tpu7x:2x2x1
jax: 0.10.0
libtpu: 0.0.40
codegen_flags: <defaults>
</compile_context>

<pallas_src>
import jax
import jax.numpy as jnp
from jax import lax
from jax.experimental import pallas as pl
from jax.experimental.pallas import tpu as pltpu


def _vmem_capacity_bytes() -> int:
    """Physical VMEM per TensorCore; falls back to device_kind sniffing."""
    try:
        return int(pltpu.get_tpu_info().vmem_capacity_bytes)
    except Exception:
        pass
    try:
        kind = jax.devices()[0].device_kind.lower()
        if "v7" in kind:
            return 64 << 20
        return 128 << 20
    except Exception:
        return 64 << 20


def _make_kernel(in_gamma: float, gamma_s: float, block_rows: int,
                 block_cols: int, chunk_rows: int):
    n_chunks = block_rows // chunk_rows
    groups = chunk_rows // 8

    def kernel(x_ref, t_ref, o_ref):
        r = pl.program_id(1)  # reduction axis (last, "arbitrary")

        @pl.when(r == 0)
        def _init():
            o_ref[...] = jnp.zeros_like(o_ref)

        def body(i, acc):
            row0 = pl.multiple_of(i * chunk_rows, 8)
            x = x_ref[pl.ds(row0, chunk_rows), :].astype(jnp.float32)
            t = t_ref[pl.ds(row0, chunk_rows), :].astype(jnp.float32)
            diff = t - x
            w = 1.0 - gamma_s * jnp.exp((-in_gamma) * t)   # exp -> EUP slot
            contrib = w * (diff * diff)                     # (chunk_rows, BC)
            # Fold to (8, BC) with pure VPU vreg adds over sublane groups (no XLU).
            part = contrib[0:8, :]
            for g in range(1, groups):
                part = part + contrib[g * 8:(g + 1) * 8, :]
            return acc + part

        partial = lax.fori_loop(0, n_chunks, body,
                                jnp.zeros((8, block_cols), jnp.float32))
        o_ref[0] += partial

    return kernel


def regression_loss(x, target, in_gamma: float, gamma_s: float = 0.9, *,
                    target_block_bytes: int = 8 * 1024 * 1024,
                    block_cols: int = 512,
                    block_rows: int = None,
                    chunk_rows: int = 32):
    """Pallas TPU implementation of RegressionLoss.forward. Returns a scalar f32."""
    assert x.shape == target.shape and x.ndim >= 1
    assert x.dtype == target.dtype
    batch = x.shape[0]
    n_elem = x.size
    elem_bytes = jnp.dtype(x.dtype).itemsize

    BC = int(block_cols)
    assert BC % 128 == 0
    CH = max(8, -(-int(chunk_rows) // 8) * 8)            # chunk rows, multiple of 8

    vmem_cap = _vmem_capacity_bytes()
    vmem_budget = (vmem_cap * 3) // 4                     # ~96 MiB v5e/v6e, ~48 MiB v7x
    # 2 inputs x 2 pipeline buffers per block + headroom must fit the budget.
    max_block_bytes = max(1 << 20, (vmem_budget - (6 << 20)) // 4)
    tgt_bytes = min(int(target_block_bytes), max_block_bytes)

    rows = -(-n_elem // BC)
    if block_rows is not None:
        BR = max(CH, -(-int(block_rows) // CH) * CH)
    else:
        tgt_rows = max(CH, (tgt_bytes // (BC * elem_bytes)) // CH * CH)
        BR = min(tgt_rows, -(-rows // CH) * CH)
    BR = max(BR, CH)

    n_blocks = -(-rows // BR)
    n_par = 2 if n_blocks >= 2 else 1                     # use both TCs on multi-TC chips
    n_blocks = -(-n_blocks // n_par) * n_par              # no idle core for odd counts
    n_red = n_blocks // n_par
    rows_padded = n_blocks * BR
    total_padded = rows_padded * BC

    # Flatten + zero-pad: padded elements have diff == 0 -> contribute exactly 0.
    xf = jnp.ravel(x)
    tf = jnp.ravel(target)
    pad = total_padded - n_elem
    if pad:
        # TODO(synk): mask the ragged tail in-kernel instead of a padded HBM copy.
        xf = jnp.pad(xf, (0, pad))
        tf = jnp.pad(tf, (0, pad))
    x2 = xf.reshape(rows_padded, BC)
    t2 = tf.reshape(rows_padded, BC)

    kernel = _make_kernel(float(in_gamma), float(gamma_s), BR, BC, CH)

    in_block_bytes = BR * BC * elem_bytes
    needed = 4 * in_block_bytes + 2 * (8 * BC * 4) + (4 << 20)
    vmem_limit = int(min(max(needed + needed // 2, 32 << 20), vmem_budget))

    out = pl.pallas_call(
        kernel,
        out_shape=jax.ShapeDtypeStruct((n_par, 8, BC), jnp.float32),
        grid_spec=pltpu.PrefetchScalarGridSpec(
            num_scalar_prefetch=0,
            grid=(n_par, n_red),
            in_specs=[
                pl.BlockSpec((BR, BC), lambda p, r: (p * n_red + r, 0)),
                pl.BlockSpec((BR, BC), lambda p, r: (p * n_red + r, 0)),
            ],
            # Lane-dense f32 partials, one resident slab per parallel block.
            out_specs=pl.BlockSpec((1, 8, BC), lambda p, r: (p, 0, 0)),
        ),
        compiler_params=pltpu.CompilerParams(
            dimension_semantics=("parallel", "arbitrary"),
            vmem_limit_bytes=vmem_limit,
        ),
    )(x2, t2)

    # Tiny epilogue: sum of partials (padding contributed 0) and the 1/batch scale.
    return jnp.sum(out) * jnp.float32(1.0 / batch)


def regression_loss_ref(x, target, in_gamma: float, gamma_s: float = 0.9):
    x = x.astype(jnp.float32)
    target = target.astype(jnp.float32)
    delta = (target - x) ** 2
    w = 1.0 - gamma_s * jnp.exp(-in_gamma * target)
    return jnp.sum(jnp.mean(w * delta, axis=0))


if __name__ == "__main__":
    key = jax.random.PRNGKey(0)
    k1, k2, k3, k4, k5, k6 = jax.random.split(key, 6)

    in_gamma = 0.5
    gamma_s = 0.9

    # Test 1: small f32 problem, default (single-block) path.
    B1, F1 = 8, 256
    x1 = jax.random.normal(k1, (B1, F1), dtype=jnp.float32)
    t1 = jax.random.normal(k2, (B1, F1), dtype=jnp.float32)
    loss1 = jax.block_until_ready(regression_loss(x1, t1, in_gamma, gamma_s))
    ref1 = regression_loss_ref(x1, t1, in_gamma, gamma_s)
    assert jnp.allclose(loss1, ref1, rtol=1e-5, atol=1e-5), (loss1, ref1)

    # Test 2: bf16 inputs at the HBM boundary, forced multi-block + parallel grid.
    B2, F2 = 4, 512
    x2 = jax.random.normal(k3, (B2, F2), dtype=jnp.bfloat16)
    t2 = jax.random.normal(k4, (B2, F2), dtype=jnp.bfloat16)
    loss2 = jax.block_until_ready(
        regression_loss(x2, t2, in_gamma, gamma_s,
                        block_cols=128, block_rows=8, chunk_rows=8))
    ref2 = regression_loss_ref(x2, t2, in_gamma, gamma_s)
    assert jnp.allclose(loss2, ref2, rtol=1e-4, atol=1e-4), (loss2, ref2)

    # Test 3: ragged element count + odd block count (zero padding + even split).
    B3, F3 = 5, 600
    x3 = jax.random.normal(k5, (B3, F3), dtype=jnp.float32)
    t3 = jax.random.normal(k6, (B3, F3), dtype=jnp.float32)
    loss3 = jax.block_until_ready(
        regression_loss(x3, t3, in_gamma, gamma_s,
                        block_cols=128, block_rows=8, chunk_rows=8))
    ref3 = regression_loss_ref(x3, t3, in_gamma, gamma_s)
    assert jnp.allclose(loss3, ref3, rtol=1e-5, atol=1e-5), (loss3, ref3)

    print("KERNEL_OK")
</pallas_src>

<mosaic_0001>
module attributes {stable_mosaic.version = 11 : i64} {
  func.func @kernel(%arg0: i32, %arg1: i32, %arg2: memref<32x512xf32, #tpu.memory_space<vmem>>, %arg3: memref<32x512xf32, #tpu.memory_space<vmem>>, %arg4: memref<1x8x512xf32, #tpu.memory_space<vmem>>) attributes {dimension_semantics = [#tpu.dimension_semantics<parallel>, #tpu.dimension_semantics<arbitrary>], iteration_bounds = array<i64: 1, 1>, scalar_prefetch = 0 : i64, scratch_operands = 0 : i64, tpu.core_type = #tpu.core_type<tc>, window_params = [{transform_indices = @transform_0, window_bounds = array<i64: 32, 512>}, {transform_indices = @transform_1, window_bounds = array<i64: 32, 512>}, {transform_indices = @transform_2, window_bounds = array<i64: 1, 8, 512>}]} {
    %c0_i32 = arith.constant 0 : i32
    %0 = arith.cmpi eq, %arg1, %c0_i32 : i32
    %1 = arith.extui %0 : i1 to i32
    %c0_i32_0 = arith.constant 0 : i32
    %2 = arith.cmpi ne, %1, %c0_i32_0 : i32
    scf.if %2 {
      %cst_12 = arith.constant 0.000000e+00 : f32
      %34 = vector.broadcast %cst_12 : f32 to vector<1x8x512xf32>
      %c0_13 = arith.constant 0 : index
      %c0_14 = arith.constant 0 : index
      %c0_15 = arith.constant 0 : index
      %35 = vector.load %arg4[%c0_13, %c0_14, %c0_15] : memref<1x8x512xf32, #tpu.memory_space<vmem>>, vector<1x8x512xf32>
      tpu.vector_store %arg4[%c0_13, %c0_14, %c0_15], %34 {strides = array<i32>} : memref<1x8x512xf32, #tpu.memory_space<vmem>>, vector<1x8x512xf32>,
    } else {
    }
    %cst = arith.constant 0.000000e+00 : f32
    %3 = vector.broadcast %cst : f32 to vector<8x512xf32>
    %c0_i32_1 = arith.constant 0 : i32
    %c32_i32 = arith.constant 32 : i32
    %4 = arith.muli %c0_i32_1, %c32_i32 : i32
    %5 = tpu.assume_multiple %4, 8 : i32
    %6 = arith.index_cast %5 : i32 to index
    %c0 = arith.constant 0 : index
    %7 = vector.load %arg2[%6, %c0] : memref<32x512xf32, #tpu.memory_space<vmem>>, vector<32x512xf32>
    %8 = arith.index_cast %5 : i32 to index
    %c0_2 = arith.constant 0 : index
    %9 = vector.load %arg3[%8, %c0_2] : memref<32x512xf32, #tpu.memory_space<vmem>>, vector<32x512xf32>
    %10 = arith.subf %9, %7 : vector<32x512xf32>
    %cst_3 = arith.constant -5.000000e-01 : f32
    %11 = vector.broadcast %cst_3 : f32 to vector<32x512xf32>
    %12 = arith.mulf %11, %9 : vector<32x512xf32>
    %13 = math.exp %12 : vector<32x512xf32>
    %cst_4 = arith.constant 0.899999976 : f32
    %14 = vector.broadcast %cst_4 : f32 to vector<32x512xf32>
    %15 = arith.mulf %14, %13 : vector<32x512xf32>
    %cst_5 = arith.constant 1.000000e+00 : f32
    %16 = vector.broadcast %cst_5 : f32 to vector<32x512xf32>
    %17 = arith.subf %16, %15 : vector<32x512xf32>
    %18 = arith.mulf %10, %10 : vector<32x512xf32>
    %19 = arith.mulf %17, %18 : vector<32x512xf32>
    %20 = vector.extract_strided_slice %19 {offsets = [0, 0], sizes = [8, 512], strides = [1, 1]} : vector<32x512xf32> to vector<8x512xf32>
    %21 = vector.extract_strided_slice %19 {offsets = [8, 0], sizes = [8, 512], strides = [1, 1]} : vector<32x512xf32> to vector<8x512xf32>
    %22 = arith.addf %20, %21 : vector<8x512xf32>
    %23 = vector.extract_strided_slice %19 {offsets = [16, 0], sizes = [8, 512], strides = [1, 1]} : vector<32x512xf32> to vector<8x512xf32>
    %24 = arith.addf %22, %23 : vector<8x512xf32>
    %25 = vector.extract_strided_slice %19 {offsets = [24, 0], sizes = [8, 512], strides = [1, 1]} : vector<32x512xf32> to vector<8x512xf32>
    %26 = arith.addf %24, %25 : vector<8x512xf32>
    %27 = arith.addf %3, %26 : vector<8x512xf32>
    %c1_i32 = arith.constant 1 : i32
    %c0_6 = arith.constant 0 : index
    %c0_7 = arith.constant 0 : index
    %c0_8 = arith.constant 0 : index
    %28 = vector.load %arg4[%c0_6, %c0_7, %c0_8] : memref<1x8x512xf32, #tpu.memory_space<vmem>>, vector<1x8x512xf32>
    %29 = vector.shape_cast %28 : vector<1x8x512xf32> to vector<8x512xf32>
    %30 = arith.addf %29, %27 : vector<8x512xf32>
    %c0_9 = arith.constant 0 : index
    %c0_10 = arith.constant 0 : index
    %c0_11 = arith.constant 0 : index
    %31 = vector.load %arg4[%c0_9, %c0_10, %c0_11] : memref<1x8x512xf32, #tpu.memory_space<vmem>>, vector<1x8x512xf32>
    %32 = vector.shape_cast %31 : vector<1x8x512xf32> to vector<8x512xf32>
    %33 = vector.shape_cast %30 : vector<8x512xf32> to vector<1x8x512xf32>
    tpu.vector_store %arg4[%c0_9, %c0_10, %c0_11], %33 {strides = array<i32>} : memref<1x8x512xf32, #tpu.memory_space<vmem>>, vector<1x8x512xf32>,
    return
  }
  func.func @transform_0(%arg0: i32, %arg1: i32) -> (i32, i32) {
    %c1_i32 = arith.constant 1 : i32
    %0 = arith.muli %arg0, %c1_i32 : i32
    %1 = arith.addi %0, %arg1 : i32
    %c0_i32 = arith.constant 0 : i32
    %c0_i32_0 = arith.constant 0 : i32
    return %1, %c0_i32 : i32, i32
  }
  func.func @transform_1(%arg0: i32, %arg1: i32) -> (i32, i32) {
    %c1_i32 = arith.constant 1 : i32
    %0 = arith.muli %arg0, %c1_i32 : i32
    %1 = arith.addi %0, %arg1 : i32
    %c0_i32 = arith.constant 0 : i32
    %c0_i32_0 = arith.constant 0 : i32
    return %1, %c0_i32 : i32, i32
  }
  func.func @transform_2(%arg0: i32, %arg1: i32) -> (i32, i32, i32) {
    %c0_i32 = arith.constant 0 : i32
    %c0_i32_0 = arith.constant 0 : i32
    %c0_i32_1 = arith.constant 0 : i32
    return %arg0, %c0_i32, %c0_i32_0 : i32, i32, i32
  }
}

</mosaic_0001>

<bundles_post_ra>
// kernel: tpu_custom_call.1
= control target key start
LH: loop header
LB: loop body
LE: loop exit
PB: predicated region body
PF: predicated region fallthrough
CT: control target
= control target key end

     0   :  { %7 = vsyncpa [#allocation3], 0  ;;  %s480_s0 = inlined_call_operand.hbm [shape: f32[32,512], index: 0, kind: input, shape index: {}]   ;;  %s481_s1 = inlined_call_operand.hbm [shape: f32[32,512], index: 1, kind: input, shape index: {}]   ;;  %s482_s2 = inlined_call_operand.hbm [shape: f32[1,8,512], index: 2, kind: output, shape index: {}]  }
   0x1   :  { %8 = vsyncpa [#allocation6], 0 }
   0x2   :  { %9 = vsyncpa [#allocation4], 0  ;;  %s381_s9 = smov [#allocation2]   ;;  %s309_s13 = scalar_lea.hbm %s480_s0, 2048 }
   0x3   :  { %s20_s10 = sshll.u32 %s381_s9, 4  ;;  %p310_p0 = scmp.ne.s32.totalorder %s480_s0, %s309_s13  ;;  %s21_s10 = int_to_ptr.vmem [resolvable:$true] %s20_s10 }
   0x4   :  { %p313_p1 = scmp.lt.u32.totalorder %s309_s13, %s480_s0 }
   0x6   :  { %p315_p2 = pnand %p313_p1, %p310_p0 }
   0x8   :  { %318 = shalt.err (!%p315_p2)
}
   0x9   :  { %s319_s18 = scalar_lea.vmem %s21_s10, 2048  ;;  %p324_p4 = scmp.lt.s32.totalorder %s21_s10, %s21_s10 }
   0xa   :  { %p320_p3 = scmp.ne.s32.totalorder %s21_s10, %s319_s18  ;;  %p325_p5 = scmp.lt.s32.totalorder %s319_s18, %s319_s18 }
   0xc   :  { %p326_p6 = por %p325_p5, %p324_p4 }
   0xe   :  { %p327_p7 = pnand %p326_p6, %p320_p3 }
  0x10   :  { %330 = shalt.err (!%p327_p7)
}
  0x11   :  { %s382_s19 = smov 512   ;;  %s383_s20 = smov 32  }
  0x12   :  { %26 = dma.hbm_to_vmem [thread:$0]  %s480_s0, 2048, %s21_s10, [#allocation3], %s382_s19, %s382_s19, %s383_s20  }
  0x13   :  { %s384_s23 = smov [#allocation5]   ;;  %s331_s27 = scalar_lea.hbm %s481_s1, 2048 }
  0x14   :  { %s37_s24 = sshll.u32 %s384_s23, 4  ;;  %p332_p8 = scmp.ne.s32.totalorder %s481_s1, %s331_s27  ;;  %s38_s24 = int_to_ptr.vmem [resolvable:$true] %s37_s24 }
  0x15   :  { %p335_p9 = scmp.lt.u32.totalorder %s331_s27, %s481_s1 }
  0x17   :  { %p337_p10 = pnand %p335_p9, %p332_p8 }
  0x19   :  { %340 = shalt.err (!%p337_p10)
}
  0x1a   :  { %s341_s4 = scalar_lea.vmem %s38_s24, 2048  ;;  %p346_p12 = scmp.lt.s32.totalorder %s38_s24, %s38_s24 }
  0x1b   :  { %p342_p11 = scmp.ne.s32.totalorder %s38_s24, %s341_s4  ;;  %p347_p13 = scmp.lt.s32.totalorder %s341_s4, %s341_s4 }
  0x1d   :  { %p348_p0 = por %p347_p13, %p346_p12 }
  0x1f   :  { %p349_p1 = pnand %p348_p0, %p342_p11 }
  0x21   :  { %352 = shalt.err (!%p349_p1)
}
  0x22   :  { %43 = dma.hbm_to_vmem [thread:$0]  %s481_s1, 2048, %s38_s24, [#allocation6], %s382_s19, %s382_s19, %s383_s20  }
  0x23   :  { %375 = dma.done.wait [#allocation3], 2048  }
  0x24   :  { %376 = vsyncadd [#allocation3], 4294965248 }
  0x25   :  { %377 = dma.done.wait [#allocation6], 2048  }
  0x26   :  { %378 = vsyncadd [#allocation6], 4294965248  ;;  %v65_v0 = vld [vmem:[#allocation2] sm:$0xff]  ;;  %v66_v13 = vld [vmem:[#allocation2 + $0x8] sm:$0xff]  ;;  %s385_s1 = smov [#allocation7]  }
  0x27   :  { %v83_v1 = vld [vmem:[#allocation5] sm:$0xff]  ;;  %v84_v16 = vld [vmem:[#allocation5 + $0x8] sm:$0xff]  ;;  %v67_v34 = vld [vmem:[#allocation2 + $0x10] sm:$0xff]  ;;  %s261_s6 = sshll.u32 %s385_s1, 4  ;;  %s262_s6 = int_to_ptr.vmem [resolvable:$true] %s261_s6 }
  0x28   :  { %v87_v2 = vld [vmem:[#allocation5 + $0x20] sm:$0xff]  ;;  %v115_v6 = vmul.f32 -0.5, %v83_v1  ;;  %v99_v10 = vsub.f32 %v83_v1, %v65_v0  ;;  %v88_v17 = vld [vmem:[#allocation5 + $0x28] sm:$0xff]  ;;  %v116_v27 = vmul.f32 -0.5, %v84_v16  ;;  %v100_v31 = vsub.f32 %v84_v16, %v66_v13  ;;  %v85_v38 = vld [vmem:[#allocation5 + $0x10] sm:$0xff]  ;;  %s353_s7 = scalar_lea.vmem %s262_s6, 512  ;;  %p358_p3 = scmp.lt.s32.totalorder %s262_s6, %s262_s6 }
  0x29   :  { %v69_v3 = vld [vmem:[#allocation2 + $0x20] sm:$0xff]  ;;  %v119_v7 = vmul.f32 -0.5, %v87_v2  ;;  %v92_v21 = vld [vmem:[#allocation5 + $0x48] sm:$0xff]  ;;  %v120_v28 = vmul.f32 -0.5, %v88_v17  ;;  %v89_v39 = vld [vmem:[#allocation5 + $0x30] sm:$0xff]  ;;  %v117_v50 = vmul.f32 -0.5, %v85_v38  ;;  %v101_v55 = vsub.f32 %v85_v38, %v67_v34  ;;  %p354_p2 = scmp.ne.s32.totalorder %s262_s6, %s353_s7  ;;  %p359_p4 = scmp.lt.s32.totalorder %s353_s7, %s353_s7 }
  0x2a   :  { %v91_v4 = vld [vmem:[#allocation5 + $0x40] sm:$0xff]  ;;  %v131_v14 = vmul.f32 1.442695, %v115_v6  ;;  %v103_v18 = vsub.f32 %v87_v2, %v69_v3  ;;  %v96_v22 = vld [vmem:[#allocation5 + $0x68] sm:$0xff]  ;;  %v425_v25 = vmul.f32 %v99_v10, %v99_v10  ;;  %v124_v32 = vmul.f32 -0.5, %v92_v21  ;;  %v93_v44 = vld [vmem:[#allocation5 + $0x50] sm:$0xff] }
  0x2b   :  { %v95_v5 = vld [vmem:[#allocation5 + $0x60] sm:$0xff]  ;;  %v123_v11 = vmul.f32 -0.5, %v91_v4  ;;  %v139_v15 = vmul.f32 1.442695, %v119_v7  ;;  %v70_v26 = vld [vmem:[#allocation2 + $0x28] sm:$0xff]  ;;  %v128_v33 = vmul.f32 -0.5, %v96_v22  ;;  %v433_v49 = vmul.f32 %v100_v31, %v100_v31  ;;  %p360_p5 = por %p359_p4, %p358_p3 }
  0x2c   :  { %v73_v8 = vld [vmem:[#allocation2 + $0x40] sm:$0xff]  ;;  %v127_v12 = vmul.f32 -0.5, %v95_v5  ;;  %277 = vpow2.f32 %v131_v14  ;;  %v74_v29 = vld [vmem:[#allocation2 + $0x48] sm:$0xff]  ;;  %v427_v35 = vmul.f32 %v103_v18, %v103_v18  ;;  %v133_v36 = vmul.f32 1.442695, %v116_v27  ;;  %v97_v45 = vld [vmem:[#allocation5 + $0x70] sm:$0xff] }
  0x2d   :  { %v77_v9 = vld [vmem:[#allocation2 + $0x60] sm:$0xff]  ;;  %v147_v19 = vmul.f32 1.442695, %v123_v11  ;;  %v107_v23 = vsub.f32 %v91_v4, %v73_v8  ;;  %279 = vpow2.f32 %v139_v15  ;;  %v78_v30 = vld [vmem:[#allocation2 + $0x68] sm:$0xff]  ;;  %v141_v37 = vmul.f32 1.442695, %v120_v28  ;;  %p361_p6 = pnand %p360_p5, %p354_p2 }
  0x2e   :  { %v155_v20 = vmul.f32 1.442695, %v127_v12  ;;  %v111_v24 = vsub.f32 %v95_v5, %v77_v9  ;;  %v104_v41 = vsub.f32 %v88_v17, %v70_v26  ;;  %v149_v42 = vmul.f32 1.442695, %v124_v32  ;;  %v71_v52 = vld [vmem:[#allocation2 + $0x30] sm:$0xff]  ;;  %v437_v61 = vld [vmem:[#allocation5 + $0x18] sm:$0xff] }
  0x2f   :  { %281 = vpow2.f32 %v147_v19  ;;  %v429_v40 = vmul.f32 %v107_v23, %v107_v23  ;;  %v157_v43 = vmul.f32 1.442695, %v128_v33  ;;  %v108_v47 = vsub.f32 %v92_v21, %v74_v29  ;;  %v75_v53 = vld [vmem:[#allocation2 + $0x50] sm:$0xff]  ;;  %v443_v2 = vld [vmem:[#allocation5 + $0x38] sm:$0xff] }
  0x30   :  { %283 = vpow2.f32 %v155_v20  ;;  %v431_v46 = vmul.f32 %v111_v24, %v111_v24  ;;  %v112_v48 = vsub.f32 %v96_v22, %v78_v30  ;;  %v121_v51 = vmul.f32 -0.5, %v89_v39  ;;  %v79_v54 = vld [vmem:[#allocation2 + $0x70] sm:$0xff]  ;;  %v445_v3 = vld [vmem:[#allocation5 + $0x58] sm:$0xff] }
  0x31   :  { %285 = vpow2.f32 %v133_v36  ;;  %v125_v56 = vmul.f32 -0.5, %v93_v44  ;;  %v129_v57 = vmul.f32 -0.5, %v97_v45  ;;  %v435_v58 = vmul.f32 %v104_v41, %v104_v41  ;;  %v447_v8 = vld [vmem:[#allocation5 + $0x78] sm:$0xff] }
  0x32   :  { %287 = vpow2.f32 %v141_v37  ;;  %v135_v59 = vmul.f32 1.442695, %v117_v50  ;;  %v143_v60 = vmul.f32 1.442695, %v121_v51  ;;  %v439_v62 = vmul.f32 %v108_v47, %v108_v47  ;;  %v68_v50 = vld [vmem:[#allocation2 + $0x18] sm:$0xff] }
  0x33   :  { %289 = vpow2.f32 %v149_v42  ;;  %v441_v63 = vmul.f32 %v112_v48, %v112_v48  ;;  %v151_v0 = vmul.f32 1.442695, %v125_v56  ;;  %v159_v1 = vmul.f32 1.442695, %v129_v57  ;;  %v72_v57 = vld [vmem:[#allocation2 + $0x38] sm:$0xff] }
  0x34   :  { %291 = vpow2.f32 %v157_v43  ;;  %v105_v5 = vsub.f32 %v89_v39, %v71_v52  ;;  %v109_v6 = vsub.f32 %v93_v44, %v75_v53  ;;  %v113_v7 = vsub.f32 %v97_v45, %v79_v54 }
  0x35   :  { %293 = vpow2.f32 %v135_v59  ;;  %v449_v11 = vmul.f32 %v101_v55, %v101_v55  ;;  %v118_v12 = vmul.f32 -0.5, %v437_v61  ;;  %v122_v15 = vmul.f32 -0.5, %v443_v2 }
  0x36   :  { %v278_v4 = vpop.eup %277  ;;  %295 = vpow2.f32 %v143_v60  ;;  %v126_v16 = vmul.f32 -0.5, %v445_v3  ;;  %v130_v20 = vmul.f32 -0.5, %v447_v8  ;;  %v201_v23 = vmul.f32 %v105_v5, %v105_v5 }
  0x37   :  { %v280_v9 = vpop.eup %279  ;;  %v163_v10 = vmul.f32 0.9, %v278_v4  ;;  %297 = vpow2.f32 %v151_v0  ;;  %v137_v24 = vmul.f32 1.442695, %v118_v12  ;;  %v145_v29 = vmul.f32 1.442695, %v122_v15 }
  0x38   :  { %v167_v14 = vmul.f32 0.9, %v280_v9  ;;  %299 = vpow2.f32 %v159_v1  ;;  %v153_v30 = vmul.f32 1.442695, %v126_v16  ;;  %v161_v39 = vmul.f32 1.442695, %v130_v20 }
  0x39   :  { %v282_v13 = vpop.eup %281  ;;  %v179_v19 = vsub.f32 1.0, %v163_v10  ;;  %301 = vpow2.f32 %v137_v24  ;;  %v205_v48 = vmul.f32 %v109_v6, %v109_v6  ;;  %v102_v4 = vsub.f32 %v437_v61, %v68_v50  ;;  %v76_v12 = vld [vmem:[#allocation2 + $0x58] sm:$0xff] }
  0x3a   :  { %v284_v17 = vpop.eup %283  ;;  %v171_v18 = vmul.f32 0.9, %v282_v13  ;;  %v183_v22 = vsub.f32 1.0, %v167_v14  ;;  %303 = vpow2.f32 %v145_v29  ;;  %v80_v13 = vld [vmem:[#allocation2 + $0x78] sm:$0xff] }
  0x3b   :  { %v175_v21 = vmul.f32 0.9, %v284_v17  ;;  %v286_v26 = vpop.eup %285  ;;  %v211_v28 = vmul.f32 %v425_v25, %v179_v19  ;;  %305 = vpow2.f32 %v153_v30  ;;  %v110_v19 = vsub.f32 %v445_v3, %v76_v12 }
  0x3c   :  { %v187_v27 = vsub.f32 1.0, %v171_v18  ;;  %v288_v31 = vpop.eup %287  ;;  %v215_v33 = vmul.f32 %v427_v35, %v183_v22  ;;  %v164_v34 = vmul.f32 0.9, %v286_v26  ;;  %307 = vpow2.f32 %v161_v39 }
  0x3d   :  { %v191_v32 = vsub.f32 1.0, %v175_v21  ;;  %v290_v36 = vpop.eup %289  ;;  %v168_v38 = vmul.f32 0.9, %v288_v31  ;;  %v198_v26 = vmul.f32 %v102_v4, %v102_v4 }
  0x3e   :  { %v219_v37 = vmul.f32 %v429_v40, %v187_v27  ;;  %v292_v41 = vpop.eup %291  ;;  %v227_v43 = vadd.f32 %v215_v33, %v211_v28  ;;  %v172_v44 = vmul.f32 0.9, %v290_v36  ;;  %v180_v25 = vsub.f32 1.0, %v164_v34 }
  0x3f   :  { %v223_v42 = vmul.f32 %v431_v46, %v191_v32  ;;  %v176_v45 = vmul.f32 0.9, %v292_v41  ;;  %v184_v47 = vsub.f32 1.0, %v168_v38  ;;  %v294_v35 = vpop.eup %293  ;;  %v209_v46 = vmul.f32 %v113_v7, %v113_v7 }
  0x40   :  { %v231_v51 = vadd.f32 %v227_v43, %v219_v37  ;;  %v188_v52 = vsub.f32 1.0, %v172_v44  ;;  %v212_v53 = vmul.f32 %v433_v49, %v180_v25  ;;  %v296_v40 = vpop.eup %295  ;;  %v165_v56 = vmul.f32 0.9, %v294_v35 }
  0x41   :  { %v192_v54 = vsub.f32 1.0, %v176_v45  ;;  %v216_v55 = vmul.f32 %v435_v58, %v184_v47  ;;  %v298_v59 = vpop.eup %297  ;;  %v169_v1 = vmul.f32 0.9, %v296_v40  ;;  %v106_v7 = vsub.f32 %v443_v2, %v72_v57 }
  0x42   :  { %v235_v60 = vadd.f32 %v231_v51, %v223_v42  ;;  %v220_v0 = vmul.f32 %v439_v62, %v188_v52  ;;  %v300_v5 = vpop.eup %299  ;;  %v173_v49 = vmul.f32 0.9, %v298_v59  ;;  %v181_v10 = vsub.f32 1.0, %v165_v56 }
  0x43   :  { %v224_v6 = vmul.f32 %v441_v63, %v192_v54  ;;  %v228_v9 = vadd.f32 %v216_v55, %v212_v53  ;;  %v177_v14 = vmul.f32 0.9, %v300_v5  ;;  %v185_v58 = vsub.f32 1.0, %v169_v1  ;;  %v302_v62 = vpop.eup %301 }
  0x44   :  { %v189_v16 = vsub.f32 1.0, %v173_v49  ;;  %v213_v17 = vmul.f32 %v449_v11, %v181_v10  ;;  %251 = vst [vmem:[#allocation7] sm:$0xff] %v235_v60  ;;  %v114_v63 = vsub.f32 %v447_v8, %v80_v13  ;;  %v304_v20 = vpop.eup %303  ;;  %v166_v24 = vmul.f32 0.9, %v302_v62 }
  0x45   :  { %v232_v15 = vadd.f32 %v228_v9, %v220_v0  ;;  %v193_v18 = vsub.f32 1.0, %v177_v14  ;;  %v217_v61 = vmul.f32 %v201_v23, %v185_v58  ;;  %v170_v2 = vmul.f32 0.9, %v304_v20  ;;  %v306_v30 = vpop.eup %305 }
  0x46   :  { %v221_v22 = vmul.f32 %v205_v48, %v189_v16  ;;  %v202_v29 = vmul.f32 %v106_v7, %v106_v7  ;;  %v182_v31 = vsub.f32 1.0, %v166_v24  ;;  %v308_v11 = vpop.eup %307  ;;  %v174_v33 = vmul.f32 0.9, %v306_v30 }
  0x47   :  { %v236_v21 = vadd.f32 %v232_v15, %v224_v6  ;;  %v225_v27 = vmul.f32 %v209_v46, %v193_v18  ;;  %v229_v28 = vadd.f32 %v217_v61, %v213_v17  ;;  %v186_v34 = vsub.f32 1.0, %v170_v2 }
  0x48   :  { %v206_v23 = vmul.f32 %v110_v19, %v110_v19  ;;  %v178_v3 = vmul.f32 0.9, %v308_v11  ;;  %v210_v36 = vmul.f32 %v114_v63, %v114_v63  ;;  %v214_v8 = vmul.f32 %v198_v26, %v182_v31 }
  0x49   :  { %v233_v32 = vadd.f32 %v229_v28, %v221_v22  ;;  %252 = vst [vmem:[#allocation7 + $0x8] sm:$0xff] %v236_v21  ;;  %v190_v38 = vsub.f32 1.0, %v174_v33  ;;  %v218_v39 = vmul.f32 %v202_v29, %v186_v34 }
  0x4a   :  { %v194_v41 = vsub.f32 1.0, %v178_v3 }
  0x4b   :  { %v237_v37 = vadd.f32 %v233_v32, %v225_v27  ;;  %v222_v42 = vmul.f32 %v206_v23, %v190_v38  ;;  %v230_v43 = vadd.f32 %v218_v39, %v214_v8 }
  0x4c   :  { %v226_v44 = vmul.f32 %v210_v36, %v194_v41 }
  0x4d   :  { %253 = vst [vmem:[#allocation7 + $0x10] sm:$0xff] %v237_v37  ;;  %v234_v25 = vadd.f32 %v230_v43, %v222_v42 }
  0x4f   :  { %v238_v45 = vadd.f32 %v234_v25, %v226_v44 }
  0x51   :  { %254 = vst [vmem:[#allocation7 + $0x18] sm:$0xff] %v238_v45 }
  0x52   :  { %364 = shalt.err (!%p361_p6)
}
  0x53   :  { %s365_s10 = scalar_lea.hbm %s482_s2, 512 }
  0x54   :  { %p366_p7 = scmp.ne.s32.totalorder %s482_s2, %s365_s10  ;;  %p369_p8 = scmp.lt.u32.totalorder %s365_s10, %s482_s2 }
  0x56   :  { %p371_p9 = pnand %p369_p8, %p366_p7 }
  0x58   :  { %374 = shalt.err (!%p371_p9)
}
  0x59   :  { %264 = dma.vmem_to_hbm [thread:$0]  %s262_s6, 512, %s482_s2, [#allocation4]  }
  0x5a   :  { %379 = dma.done.wait [#allocation4], 512  }
  0x5b   :  { %380 = vsyncadd [#allocation4], 4294966784 }
  0x5c   :  { %268 = vsyncpa [#allocation3], 1 }
  0x5d   :  { %269 = vsyncpa [#allocation6], 1 }
  0x5e   :  { %270 = vsyncpa [#allocation4], 1 }

</bundles_post_ra>
